<compile_context>
chip_gen: v5e
topology: v5e:2x2
jax: 0.10.0
libtpu: 0.0.40
codegen_flags: <defaults>
</compile_context>

<pallas_src>
import jax
import jax.numpy as jnp
from jax.experimental import pallas as pl
from jax.experimental.pallas import tpu as pltpu

HIDDEN = 64          # logical hidden size (matches nn.Linear(n_input, 64))
HIDDEN_PAD = 128     # padded to one full 128-lane vreg
OUT_PAD = 128        # lane-dense output tile; wrapper slices [:, :n_out]


def dqn_kernel(x_ref, w1_ref, b1_ref, w2_ref, b2_ref, out_ref):
    # Fused padded MLP: (x @ W1p + b1p) -> tanh -> (@ W2p + b2p)
    x = x_ref[...]                                                    # (TB, n_in)
    h = jnp.dot(x, w1_ref[...], preferred_element_type=jnp.float32)  # (TB, 128) f32
    h = jnp.tanh(h + b1_ref[...])                  # bias add + tanh in f32 (v5e-safe)
    q = jnp.dot(h.astype(w2_ref.dtype), w2_ref[...],
                preferred_element_type=jnp.float32)                   # (TB, 128) f32
    out_ref[...] = (q + b2_ref[...]).astype(out_ref.dtype)            # lane-dense store


def _round_up(a, m):
    return (a + m - 1) // m * m


def dqn_forward(x, params, *, tb=256, compute_dtype=jnp.float32):
    """Batched DQN forward.  x: (B, n_input) -> (B, n_output) float32."""
    w1, b1, w2, b2 = params["w1"], params["b1"], params["w2"], params["b2"]
    n_out = params["n_out"]
    B, n_in = x.shape

    # Batch tile: multiple of 8 (f32 sublane); capped at `tb` (256 keeps the
    # double-buffered x/out tiles well inside the v7x 64 MiB VMEM budget while
    # amortizing the ~0.35 µs/step grid overhead).
    TB = min(tb, _round_up(B, 8))
    Bp = _round_up(B, TB)
    if Bp != B:
        x = jnp.pad(x, ((0, Bp - B), (0, 0)))

    x = x.astype(compute_dtype)
    w1c = w1.astype(compute_dtype)
    w2c = w2.astype(compute_dtype)
    # biases stay f32: added after the f32-accumulated matmuls.

    q_padded = pl.pallas_call(
        dqn_kernel,
        out_shape=jax.ShapeDtypeStruct((Bp, OUT_PAD), jnp.float32),
        grid=(Bp // TB,),
        in_specs=[
            pl.BlockSpec((TB, n_in), lambda i: (i, 0)),           # streamed x tile
            pl.BlockSpec((n_in, HIDDEN_PAD), lambda i: (0, 0)),   # VMEM-resident W1
            pl.BlockSpec((1, HIDDEN_PAD), lambda i: (0, 0)),      # VMEM-resident b1
            pl.BlockSpec((HIDDEN_PAD, OUT_PAD), lambda i: (0, 0)),  # VMEM-resident W2
            pl.BlockSpec((1, OUT_PAD), lambda i: (0, 0)),         # VMEM-resident b2
        ],
        out_specs=pl.BlockSpec((TB, OUT_PAD), lambda i: (i, 0)),
        compiler_params=pltpu.CompilerParams(
            dimension_semantics=("parallel",)),   # v7x: 2 TCs split the batch tiles
    )(x, w1c, b1, w2c, b2)

    return q_padded[:B, :n_out]


def dqn_act(obs, params):
    """Equivalent of DQN.act: argmax over q-values for a single observation."""
    q = dqn_forward(obs[None, :], params)
    return int(jnp.argmax(q[0]))


def init_dqn_params(key, n_input, n_output):
    """PyTorch nn.Linear default init (U(-1/sqrt(fan_in), +)), stored pre-padded."""
    k1, k2, k3, k4 = jax.random.split(key, 4)
    lim1 = 1.0 / jnp.sqrt(jnp.float32(n_input))
    lim2 = 1.0 / jnp.sqrt(jnp.float32(HIDDEN))
    w1 = jax.random.uniform(k1, (n_input, HIDDEN), jnp.float32, -lim1, lim1)
    b1 = jax.random.uniform(k2, (1, HIDDEN), jnp.float32, -lim1, lim1)
    w2 = jax.random.uniform(k3, (HIDDEN, n_output), jnp.float32, -lim2, lim2)
    b2 = jax.random.uniform(k4, (1, n_output), jnp.float32, -lim2, lim2)

    # Zero-pad to full-lane tiles (results unchanged: padded hidden columns give
    # tanh(0)=0 and multiply zero W2 rows; padded output columns are sliced off).
    w1p = jnp.zeros((n_input, HIDDEN_PAD), jnp.float32).at[:, :HIDDEN].set(w1)
    b1p = jnp.zeros((1, HIDDEN_PAD), jnp.float32).at[:, :HIDDEN].set(b1)
    w2p = jnp.zeros((HIDDEN_PAD, OUT_PAD), jnp.float32).at[:HIDDEN, :n_output].set(w2)
    b2p = jnp.zeros((1, OUT_PAD), jnp.float32).at[:, :n_output].set(b2)

    params = dict(w1=w1p, b1=b1p, w2=w2p, b2=b2p, n_out=n_output)
    unpadded = dict(w1=w1, b1=b1, w2=w2, b2=b2)
    return params, unpadded


if __name__ == "__main__":
    key = jax.random.PRNGKey(0)
    n_input, n_output = 8, 4

    kx, kb, kp = jax.random.split(key, 3)
    params, ref_p = init_dqn_params(kp, n_input, n_output)

    def reference(x):
        return jnp.tanh(x @ ref_p["w1"] + ref_p["b1"]) @ ref_p["w2"] + ref_p["b2"]

    # Small shape (the original-style call, B=2).
    x_small = jax.random.normal(kx, (2, n_input), jnp.float32)
    q_small = jax.block_until_ready(dqn_forward(x_small, params))
    assert q_small.shape == (2, n_output)
    assert jnp.allclose(q_small, reference(x_small), atol=1e-5), (q_small,
                                                                  reference(x_small))

    # Replay-buffer-sized batch exercising the batch grid (TB=256, grid=(2,)).
    x_big = jax.random.normal(kb, (512, n_input), jnp.float32)
    q_big = jax.block_until_ready(dqn_forward(x_big, params))
    assert q_big.shape == (512, n_output)
    assert jnp.allclose(q_big, reference(x_big), atol=1e-5)

    # Equivalent of DQN.act for one observation (argmax over q-values).
    action = dqn_act(x_small[0], params)
    assert 0 <= action < n_output

    print("KERNEL_OK")
</pallas_src>

<mosaic_0001>
module attributes {stable_mosaic.version = 11 : i64} {
  func.func @dqn_kernel(%arg0: i32, %arg1: memref<8x8xf32, #tpu.memory_space<vmem>>, %arg2: memref<8x128xf32, #tpu.memory_space<vmem>>, %arg3: memref<1x128xf32, #tpu.memory_space<vmem>>, %arg4: memref<128x128xf32, #tpu.memory_space<vmem>>, %arg5: memref<1x128xf32, #tpu.memory_space<vmem>>, %arg6: memref<8x128xf32, #tpu.memory_space<vmem>>) attributes {dimension_semantics = [#tpu.dimension_semantics<parallel>], iteration_bounds = array<i64: 1>, scalar_prefetch = 0 : i64, scratch_operands = 0 : i64, tpu.core_type = #tpu.core_type<tc>, window_params = [{transform_indices = @transform_0, window_bounds = array<i64: 8, 8>}, {pipeline_mode = #tpu.pipeline_mode<synchronous>, transform_indices = @transform_1, window_bounds = array<i64: 8, 128>}, {pipeline_mode = #tpu.pipeline_mode<synchronous>, transform_indices = @transform_2, window_bounds = array<i64: 1, 128>}, {pipeline_mode = #tpu.pipeline_mode<synchronous>, transform_indices = @transform_3, window_bounds = array<i64: 128, 128>}, {pipeline_mode = #tpu.pipeline_mode<synchronous>, transform_indices = @transform_4, window_bounds = array<i64: 1, 128>}, {transform_indices = @transform_5, window_bounds = array<i64: 8, 128>}]} {
    %c0 = arith.constant 0 : index
    %c0_0 = arith.constant 0 : index
    %0 = vector.load %arg1[%c0, %c0_0] : memref<8x8xf32, #tpu.memory_space<vmem>>, vector<8x8xf32>
    %c0_1 = arith.constant 0 : index
    %c0_2 = arith.constant 0 : index
    %1 = vector.load %arg2[%c0_1, %c0_2] : memref<8x128xf32, #tpu.memory_space<vmem>>, vector<8x128xf32>
    %cst = arith.constant dense<0.000000e+00> : vector<8x128xf32>
    %2 = tpu.matmul %0, %1, %cst {dimension_numbers = #tpu.dot_dimension_numbers<[1], [0], [0], [1], [0, 0, 1, 1], [], []>} : vector<8x8xf32>, vector<8x128xf32>, vector<8x128xf32> -> vector<8x128xf32>
    %c0_3 = arith.constant 0 : index
    %c0_4 = arith.constant 0 : index
    %3 = vector.load %arg3[%c0_3, %c0_4] : memref<1x128xf32, #tpu.memory_space<vmem>>, vector<1x128xf32>
    %4 = vector.broadcast %3 : vector<1x128xf32> to vector<8x128xf32>
    %5 = arith.addf %2, %4 : vector<8x128xf32>
    %6 = math.tanh %5 : vector<8x128xf32>
    %c0_5 = arith.constant 0 : index
    %c0_6 = arith.constant 0 : index
    %7 = vector.load %arg4[%c0_5, %c0_6] : memref<128x128xf32, #tpu.memory_space<vmem>>, vector<128x128xf32>
    %cst_7 = arith.constant dense<0.000000e+00> : vector<8x128xf32>
    %8 = tpu.matmul %6, %7, %cst_7 {dimension_numbers = #tpu.dot_dimension_numbers<[1], [0], [0], [1], [0, 0, 1, 1], [], []>} : vector<8x128xf32>, vector<128x128xf32>, vector<8x128xf32> -> vector<8x128xf32>
    %c0_8 = arith.constant 0 : index
    %c0_9 = arith.constant 0 : index
    %9 = vector.load %arg5[%c0_8, %c0_9] : memref<1x128xf32, #tpu.memory_space<vmem>>, vector<1x128xf32>
    %10 = vector.broadcast %9 : vector<1x128xf32> to vector<8x128xf32>
    %11 = arith.addf %8, %10 : vector<8x128xf32>
    %c0_10 = arith.constant 0 : index
    %c0_11 = arith.constant 0 : index
    %12 = vector.load %arg6[%c0_10, %c0_11] : memref<8x128xf32, #tpu.memory_space<vmem>>, vector<8x128xf32>
    tpu.vector_store %arg6[%c0_10, %c0_11], %11 {strides = array<i32>} : memref<8x128xf32, #tpu.memory_space<vmem>>, vector<8x128xf32>,
    return
  }
  func.func @transform_0(%arg0: i32) -> (i32, i32) {
    %c0_i32 = arith.constant 0 : i32
    %c0_i32_0 = arith.constant 0 : i32
    return %arg0, %c0_i32 : i32, i32
  }
  func.func @transform_1(%arg0: i32) -> (i32, i32) {
    %c0_i32 = arith.constant 0 : i32
    %c0_i32_0 = arith.constant 0 : i32
    %c0_i32_1 = arith.constant 0 : i32
    return %c0_i32, %c0_i32_0 : i32, i32
  }
  func.func @transform_2(%arg0: i32) -> (i32, i32) {
    %c0_i32 = arith.constant 0 : i32
    %c0_i32_0 = arith.constant 0 : i32
    %c0_i32_1 = arith.constant 0 : i32
    return %c0_i32, %c0_i32_0 : i32, i32
  }
  func.func @transform_3(%arg0: i32) -> (i32, i32) {
    %c0_i32 = arith.constant 0 : i32
    %c0_i32_0 = arith.constant 0 : i32
    %c0_i32_1 = arith.constant 0 : i32
    return %c0_i32, %c0_i32_0 : i32, i32
  }
  func.func @transform_4(%arg0: i32) -> (i32, i32) {
    %c0_i32 = arith.constant 0 : i32
    %c0_i32_0 = arith.constant 0 : i32
    %c0_i32_1 = arith.constant 0 : i32
    return %c0_i32, %c0_i32_0 : i32, i32
  }
  func.func @transform_5(%arg0: i32) -> (i32, i32) {
    %c0_i32 = arith.constant 0 : i32
    %c0_i32_0 = arith.constant 0 : i32
    return %arg0, %c0_i32 : i32, i32
  }
}

</mosaic_0001>

<bundles_post_ra>
// kernel: tpu_custom_call.1
= control target key start
LH: loop header
LB: loop body
LE: loop exit
PB: predicated region body
PF: predicated region fallthrough
CT: control target
= control target key end

     0   :  { %10 = vsyncpa [#allocation3], 0  ;;  %s321_s0 = inlined_call_operand.hbm [shape: f32[8,8], index: 0, kind: input, shape index: {}]   ;;  %s322_s1 = inlined_call_operand.hbm [shape: f32[8,128], index: 1, kind: input, shape index: {}]   ;;  %s323_s2 = inlined_call_operand.vmem [shape: f32[1,128], index: 2, kind: input, shape index: {}]   ;;  %s324_s3 = inlined_call_operand.hbm [shape: f32[128,128], index: 3, kind: input, shape index: {}]   ;;  %s325_s4 = inlined_call_operand.vmem [shape: f32[1,128], index: 4, kind: input, shape index: {}]   ;;  %s326_s5 = inlined_call_operand.hbm [shape: f32[8,128], index: 5, kind: output, shape index: {}]  }
   0x1   :  { %11 = vsyncpa [#allocation6], 0  ;;  %s29_s20 = sshll.u32 %s322_s1, 4  ;;  %s30_s20 = int_to_ptr.hbm [resolvable:$true] %s29_s20 }
   0x2   :  { %12 = vsyncpa [#allocation4], 0  ;;  %s267_s21 = smov [#allocation5]   ;;  %s18_s25 = sshll.u32 %s321_s0, 4  ;;  %s19_s25 = int_to_ptr.hbm [resolvable:$true] %s18_s25 }
   0x3   :  { %s31_s22 = sshll.u32 %s267_s21, 4  ;;  %s268_s26 = smov [#allocation2]   ;;  %s32_s22 = int_to_ptr.vmem [resolvable:$true] %s31_s22 }
   0x4   :  { %34 = dma.hbm_to_vmem [thread:$0]  %s30_s20, 128, %s32_s22, [#allocation6]  }
   0x5   :  { %s20_s27 = sshll.u32 %s268_s26, 4  ;;  %s41_s30 = sshll.u32 %s324_s3, 4  ;;  %s21_s27 = int_to_ptr.vmem [resolvable:$true] %s20_s27  ;;  %s42_s30 = int_to_ptr.hbm [resolvable:$true] %s41_s30 }
   0x6   :  { %23 = dma.hbm_to_vmem [thread:$0]  %s19_s25, 128, %s21_s27, [#allocation3]  }
   0x7   :  { %s269_s1 = smov [#allocation7]   ;;  %s270_s7 = smov 128  }
   0x8   :  { %s43_s6 = sshll.u32 %s269_s1, 4  ;;  %s271_s8 = smov 8   ;;  %s44_s6 = int_to_ptr.vmem [resolvable:$true] %s43_s6 }
   0x9   :  { %49 = dma.hbm_to_vmem [thread:$0]  %s42_s30, 2048, %s44_s6, [#allocation6], %s270_s7, %s270_s7, %s271_s8  }
   0xa   :  { %261 = dma.done.wait [#allocation3], 128  }
   0xb   :  { %262 = vsyncadd [#allocation3], 4294967168 }
   0xc   :  { %263 = dma.done.wait [#allocation6], 2176  }
   0xd   :  { %264 = vsyncadd [#allocation6], 4294965120  ;;  %vm70_vm0 = vcmask 64512   ;;  %v65_v0 = vld [vmem:[#allocation5] sm:$0xff]  ;;  %v64_v1 = vld [vmem:[#allocation2] sm:$0xff]  ;;  %s272_s11 = smov [#allocation8]  }
   0xe   :  { %v110_v2 = vld [vmem:[#allocation7 + $0x78] sm:$0xff]  ;;  %89 = vmatpush.msra.mxu0 %v65_v0  ;;  %v109_v3 = vld [vmem:[#allocation7 + $0x70] sm:$0xff]  ;;  %v108_v4 = vld [vmem:[#allocation7 + $0x68] sm:$0xff]  ;;  %s141_s12 = sshll.u32 %s272_s11, 4  ;;  %s143_s15 = sshll.u32 %s326_s5, 4  ;;  %s142_s12 = int_to_ptr.vmem [resolvable:$true] %s141_s12  ;;  %s144_s15 = int_to_ptr.hbm [resolvable:$true] %s143_s15 }
   0xf   :  { %115 = vmatpush.msra.mxu1 %v110_v2  ;;  %154 = vmatmul.msk.f32.vlgmr.msra.gmra.mxu0 %vm70_vm0, %v64_v1  ;;  %v107_v5 = vld [vmem:[#allocation7 + $0x60] sm:$0xff]  ;;  %v106_v6 = vld [vmem:[#allocation7 + $0x58] sm:$0xff]  ;;  %v105_v7 = vld [vmem:[#allocation7 + $0x50] sm:$0xff] }
  0x10   :  { %v104_v8 = vld [vmem:[#allocation7 + $0x48] sm:$0xff]  ;;  %v103_v9 = vld [vmem:[#allocation7 + $0x40] sm:$0xff]  ;;  %v102_v10 = vld [vmem:[#allocation7 + $0x38] sm:$0xff] }
  0x11   :  { %116 = vmatpush.msra.mxu1 %v109_v3  ;;  %v101_v11 = vld [vmem:[#allocation7 + $0x30] sm:$0xff]  ;;  %v100_v12 = vld [vmem:[#allocation7 + $0x28] sm:$0xff]  ;;  %v99_v13 = vld [vmem:[#allocation7 + $0x20] sm:$0xff] }
  0x12   :  { %v98_v14 = vld [vmem:[#allocation7 + $0x18] sm:$0xff]  ;;  %v97_v15 = vld [vmem:[#allocation7 + $0x10] sm:$0xff]  ;;  %v96_v16 = vld [vmem:[#allocation7 + $0x8] sm:$0xff] }
  0x13   :  { %117 = vmatpush.msra.mxu1 %v108_v4  ;;  %v95_v17 = vld [vmem:[#allocation7] sm:$0xff]  ;;  %v161_v18 = vld [vmem:[%s323_s2] ss:$0 sm:$0xff] }
  0x14   :  { %v162_v22 = vld [vmem:[%s325_s4] ss:$0 sm:$0xff] }
  0x15   :  { %118 = vmatpush.msra.mxu1 %v107_v5 }
  0x17   :  { %119 = vmatpush.msra.mxu1 %v106_v6 }
  0x19   :  { %120 = vmatpush.msra.mxu1 %v105_v7 }
  0x1b   :  { %121 = vmatpush.msra.mxu1 %v104_v8 }
  0x1d   :  { %122 = vmatpush.msra.mxu1 %v103_v9 }
  0x1f   :  { %123 = vmatpush.msra.mxu1 %v102_v10 }
  0x21   :  { %124 = vmatpush.msra.mxu1 %v101_v11 }
  0x23   :  { %125 = vmatpush.msra.mxu1 %v100_v12 }
  0x25   :  { %126 = vmatpush.msra.mxu1 %v99_v13 }
  0x27   :  { %127 = vmatpush.msra.mxu1 %v98_v14 }
  0x29   :  { %128 = vmatpush.msra.mxu1 %v97_v15 }
  0x2b   :  { %129 = vmatpush.msra.mxu1 %v96_v16 }
  0x2d   :  { %130 = vmatpush.msra.mxu1 %v95_v17 }
  0x8c   :  { %v91_v19 = vpop.f32.mrf.mxu0 }
  0x8d   :  { %v92_v20 = vadd.f32 %v161_v18, %v91_v19 }
  0x8f   :  { %163 = vtanh.f32 %v92_v20 }
  0x95   :  { %v164_v21 = vpop.eup %163 }
  0x96   :  { %131 = vmatmul.f32.vlgmr.msra.gmra.mxu1 %v164_v21 }
 0x113   :  { %v132_v23 = vpop.f32.mrf.mxu1 }
 0x114   :  { %v133_v24 = vadd.f32 %v162_v22, %v132_v23 }
 0x116   :  { %135 = vst [vmem:[#allocation8] sm:$0xff] %v133_v24 }
 0x117   :  { %146 = dma.vmem_to_hbm [thread:$0]  %s142_s12, 128, %s144_s15, [#allocation4]  }
 0x118   :  { %265 = dma.done.wait [#allocation4], 128  }
 0x119   :  { %266 = vsyncadd [#allocation4], 4294967168 }
 0x11a   :  { %151 = vsyncpa [#allocation3], 1 }
 0x11b   :  { %152 = vsyncpa [#allocation6], 1 }
 0x11c   :  { %153 = vsyncpa [#allocation4], 1 }

</bundles_post_ra>
